<compile_context>
chip_gen: v5e
topology: v5e:2x2
jax: 0.10.0
libtpu: 0.0.40
codegen_flags: <defaults>
</compile_context>

<pallas_src>
import jax
import jax.numpy as jnp
from jax import lax
from jax.experimental import pallas as pl
from jax.experimental.pallas import tpu as pltpu


# -----------------------------------------------------------------------------
# Shared encoder body (operates on VMEM tiles, returns f32 embeddings)
# -----------------------------------------------------------------------------
def _encode(x, w1s, b1, w2, b2):
    # x: (TB, T, D) f32.  w1s already carries the 1/T of the sequence mean-pool,
    # so pooling is a plain sum over the sequence axis.
    pooled = jnp.sum(x, axis=1)                                           # (TB, D)
    h = jnp.dot(pooled, w1s, preferred_element_type=jnp.float32) + b1     # (TB, H)
    h = jnp.maximum(h, 0.0)                                               # ReLU
    return jnp.dot(h, w2, preferred_element_type=jnp.float32) + b2        # (TB, H)
    # TODO(synk): cast operands to bf16 (f32 accumulate) if input_size grows —
    # negligible at 128x128 weights, 2-4x MXU lever at scale.


# -----------------------------------------------------------------------------
# Kernel 1: STSModel.forward -- batch-gridded encoder (pipelined x tiles)
# -----------------------------------------------------------------------------
def _encode_kernel(x_ref, w1_ref, b1_ref, w2_ref, b2_ref, o_ref):
    o_ref[...] = _encode(
        x_ref[...].astype(jnp.float32),
        w1_ref[...], b1_ref[...], w2_ref[...], b2_ref[...],
    ).astype(o_ref.dtype)


def sts_forward(x, w1, b1, w2, b2, *, tb=None):
    B, T, D = x.shape
    H = w1.shape[1]
    if tb is None:
        tb = min(B, 256)                 # MXU-filling row tile once B is aggregated
    w1s = w1 * (1.0 / T)                 # fold mean-pool scale into first Linear (exact: T=2^k here)
    return pl.pallas_call(
        _encode_kernel,
        out_shape=jax.ShapeDtypeStruct((B, H), jnp.float32),
        grid_spec=pltpu.PrefetchScalarGridSpec(
            num_scalar_prefetch=0,
            grid=(pl.cdiv(B, tb),),
            in_specs=[
                pl.BlockSpec((tb, T, D), lambda i: (i, 0, 0)),   # pipelined x tiles
                pl.BlockSpec((D, H), lambda i: (0, 0)),          # weights stay resident
                pl.BlockSpec((1, H), lambda i: (0, 0)),
                pl.BlockSpec((H, H), lambda i: (0, 0)),
                pl.BlockSpec((1, H), lambda i: (0, 0)),
            ],
            out_specs=pl.BlockSpec((tb, H), lambda i: (i, 0)),
        ),
        compiler_params=pltpu.CompilerParams(
            dimension_semantics=("parallel",)),
    )(x, w1s, b1, w2, b2)
    # TODO(synk): if T grows large, make T a trailing "arbitrary" reduction grid axis
    # with a (tb, D) accumulator in scratch instead of a single (tb, T, D) block.


# -----------------------------------------------------------------------------
# Kernel 2: STSModel.calculate_loss -- FUSED encode + cdist + strict-upper-tri MSE
# -----------------------------------------------------------------------------
def _fused_loss_kernel(x_ref, lbl_ref, w1_ref, b1_ref, w2_ref, b2_ref,
                       emb_ref, loss_ref):
    e = _encode(
        x_ref[...].astype(jnp.float32),
        w1_ref[...], b1_ref[...], w2_ref[...], b2_ref[...],
    )                                                             # (B, H) f32
    emb_ref[...] = e.astype(emb_ref.dtype)

    B = e.shape[0]
    sq = jnp.sum(e * e, axis=-1, keepdims=True)                   # (B, 1)
    # Gram matrix: contract both operands' last (lane) dim -> no materialized e.T.
    gram = lax.dot_general(
        e, e, dimension_numbers=(((1,), (1,)), ((), ())),
        preferred_element_type=jnp.float32)                       # (B, B)
    d2 = jnp.maximum(sq + sq.T - 2.0 * gram, 0.0)

    row = lax.broadcasted_iota(jnp.int32, (B, B), 0)
    col = lax.broadcasted_iota(jnp.int32, (B, B), 1)
    mask = col > row                                              # triu(diagonal=1)

    # sqrt only where masked: keeps a future backward free of 0*inf NaNs on the diagonal.
    dist = jnp.sqrt(jnp.where(mask, d2, 1.0))                     # torch.cdist(out, out)
    diff = dist - lbl_ref[...].astype(jnp.float32)
    se = jnp.where(mask, diff * diff, 0.0)                        # MSELoss(reduction='none')
    num_active = B * (B - 1) // 2
    loss_ref[0, 0] = jnp.sum(se) * (1.0 / jnp.float32(num_active))
    # TODO(synk): for large B, tile the (B,B) distance matrix with a 2D grid and an
    # SMEM partial-SSE accumulator (tile sizes per generation: v7x 64 MiB VMEM,
    # v5e/v6e 128 MiB) instead of materializing all (B,B) intermediates at once.


def sts_calculate_loss(x, labels, w1, b1, w2, b2):
    B, T, D = x.shape
    H = w1.shape[1]
    w1s = w1 * (1.0 / T)
    vmem = pl.BlockSpec(memory_space=pltpu.MemorySpace.VMEM)
    smem = pl.BlockSpec(memory_space=pltpu.MemorySpace.SMEM)
    emb, loss = pl.pallas_call(
        _fused_loss_kernel,
        out_shape=(jax.ShapeDtypeStruct((B, H), jnp.float32),
                   jax.ShapeDtypeStruct((1, 1), jnp.float32)),
        in_specs=[vmem] * 6,
        out_specs=(vmem, smem),           # scalar loss goes to SMEM (no masked vst / DMA)
    )(x, labels, w1s, b1, w2, b2)
    return emb, loss[0, 0]


# -----------------------------------------------------------------------------
# Parameter construction (deterministic, synthetic -- no checkpoint loading)
# -----------------------------------------------------------------------------
def init_params(key, input_size):
    k1, k2, k3, k4 = jax.random.split(key, 4)
    s = 1.0 / jnp.sqrt(jnp.float32(input_size))
    w1 = jax.random.uniform(k1, (input_size, input_size), jnp.float32, -s, s)
    b1 = jax.random.uniform(k2, (1, input_size), jnp.float32, -s, s)
    w2 = jax.random.uniform(k3, (input_size, input_size), jnp.float32, -s, s)
    b2 = jax.random.uniform(k4, (1, input_size), jnp.float32, -s, s)
    return w1, b1, w2, b2


if __name__ == "__main__":
    B, T, D = 8, 16, 128     # batch, sequence length, feature dim (input_size=128)

    key = jax.random.PRNGKey(0)
    kx, kl, kp = jax.random.split(key, 3)
    x = jax.random.normal(kx, (B, T, D), dtype=jnp.float32)
    sim_labels = jnp.abs(jax.random.normal(kl, (B, B), dtype=jnp.float32))
    sim_labels = 0.5 * (sim_labels + sim_labels.T)   # symmetric label matrix
    w1, b1, w2, b2 = init_params(kp, D)

    # Pallas forward (STSModel.forward)
    out = jax.block_until_ready(sts_forward(x, w1, b1, w2, b2))

    # Pallas fused forward + loss (STSModel.calculate_loss hot path)
    emb, loss = sts_calculate_loss(x, sim_labels, w1, b1, w2, b2)
    loss = jax.block_until_ready(loss)
    emb = jax.block_until_ready(emb)

    # Pure-JAX reference checks
    pooled = jnp.mean(x, axis=1)
    ref_out = jnp.maximum(pooled @ w1 + b1, 0.0) @ w2 + b2
    assert jnp.allclose(out, ref_out, atol=1e-3, rtol=1e-3), "forward mismatch"
    assert jnp.allclose(emb, ref_out, atol=1e-3, rtol=1e-3), "fused embedding mismatch"

    d_ref = jnp.sqrt(jnp.maximum(
        jnp.sum((ref_out[:, None, :] - ref_out[None, :, :]) ** 2, axis=-1), 0.0))
    iu = jnp.triu_indices(B, k=1)
    ref_loss = jnp.mean((d_ref[iu] - sim_labels[iu]) ** 2)
    assert jnp.allclose(loss, ref_loss, atol=1e-2, rtol=1e-2), "loss mismatch"

    # TODO(synk): the real traj_encoder is an externally injected module in veccity;
    # it is replaced here by a deterministic mean-pool + 2-layer MLP encoder.
    print("KERNEL_OK")
</pallas_src>

<mosaic_0001>
module attributes {stable_mosaic.version = 11 : i64} {
  func.func @_encode_kernel(%arg0: i32, %arg1: memref<8x16x128xf32, #tpu.memory_space<vmem>>, %arg2: memref<128x128xf32, #tpu.memory_space<vmem>>, %arg3: memref<1x128xf32, #tpu.memory_space<vmem>>, %arg4: memref<128x128xf32, #tpu.memory_space<vmem>>, %arg5: memref<1x128xf32, #tpu.memory_space<vmem>>, %arg6: memref<8x128xf32, #tpu.memory_space<vmem>>) attributes {dimension_semantics = [#tpu.dimension_semantics<parallel>], iteration_bounds = array<i64: 1>, scalar_prefetch = 0 : i64, scratch_operands = 0 : i64, tpu.core_type = #tpu.core_type<tc>, window_params = [{transform_indices = @transform_0, window_bounds = array<i64: 8, 16, 128>}, {pipeline_mode = #tpu.pipeline_mode<synchronous>, transform_indices = @transform_1, window_bounds = array<i64: 128, 128>}, {pipeline_mode = #tpu.pipeline_mode<synchronous>, transform_indices = @transform_2, window_bounds = array<i64: 1, 128>}, {pipeline_mode = #tpu.pipeline_mode<synchronous>, transform_indices = @transform_3, window_bounds = array<i64: 128, 128>}, {pipeline_mode = #tpu.pipeline_mode<synchronous>, transform_indices = @transform_4, window_bounds = array<i64: 1, 128>}, {transform_indices = @transform_5, window_bounds = array<i64: 8, 128>}]} {
    %c0 = arith.constant 0 : index
    %c0_0 = arith.constant 0 : index
    %c0_1 = arith.constant 0 : index
    %0 = vector.load %arg1[%c0, %c0_0, %c0_1] : memref<8x16x128xf32, #tpu.memory_space<vmem>>, vector<8x16x128xf32>
    %c0_2 = arith.constant 0 : index
    %c0_3 = arith.constant 0 : index
    %1 = vector.load %arg2[%c0_2, %c0_3] : memref<128x128xf32, #tpu.memory_space<vmem>>, vector<128x128xf32>
    %c0_4 = arith.constant 0 : index
    %c0_5 = arith.constant 0 : index
    %2 = vector.load %arg3[%c0_4, %c0_5] : memref<1x128xf32, #tpu.memory_space<vmem>>, vector<1x128xf32>
    %c0_6 = arith.constant 0 : index
    %c0_7 = arith.constant 0 : index
    %3 = vector.load %arg4[%c0_6, %c0_7] : memref<128x128xf32, #tpu.memory_space<vmem>>, vector<128x128xf32>
    %c0_8 = arith.constant 0 : index
    %c0_9 = arith.constant 0 : index
    %4 = vector.load %arg5[%c0_8, %c0_9] : memref<1x128xf32, #tpu.memory_space<vmem>>, vector<1x128xf32>
    %cst = arith.constant dense<0.000000e+00> : vector<8x128xf32>
    %5 = vector.multi_reduction <add>, %0, %cst [1] : vector<8x16x128xf32> to vector<8x128xf32>
    %cst_10 = arith.constant dense<0.000000e+00> : vector<8x128xf32>
    %6 = tpu.matmul %5, %1, %cst_10 {dimension_numbers = #tpu.dot_dimension_numbers<[1], [0], [0], [1], [0, 0, 1, 1], [], []>} : vector<8x128xf32>, vector<128x128xf32>, vector<8x128xf32> -> vector<8x128xf32>
    %7 = vector.broadcast %2 : vector<1x128xf32> to vector<8x128xf32>
    %8 = arith.addf %6, %7 : vector<8x128xf32>
    %cst_11 = arith.constant 0.000000e+00 : f32
    %9 = vector.broadcast %cst_11 : f32 to vector<8x128xf32>
    %10 = arith.maximumf %8, %9 : vector<8x128xf32>
    %cst_12 = arith.constant dense<0.000000e+00> : vector<8x128xf32>
    %11 = tpu.matmul %10, %3, %cst_12 {dimension_numbers = #tpu.dot_dimension_numbers<[1], [0], [0], [1], [0, 0, 1, 1], [], []>} : vector<8x128xf32>, vector<128x128xf32>, vector<8x128xf32> -> vector<8x128xf32>
    %12 = vector.broadcast %4 : vector<1x128xf32> to vector<8x128xf32>
    %13 = arith.addf %11, %12 : vector<8x128xf32>
    %c0_13 = arith.constant 0 : index
    %c0_14 = arith.constant 0 : index
    %14 = vector.load %arg6[%c0_13, %c0_14] : memref<8x128xf32, #tpu.memory_space<vmem>>, vector<8x128xf32>
    tpu.vector_store %arg6[%c0_13, %c0_14], %13 {strides = array<i32>} : memref<8x128xf32, #tpu.memory_space<vmem>>, vector<8x128xf32>,
    return
  }
  func.func @transform_0(%arg0: i32) -> (i32, i32, i32) {
    %c0_i32 = arith.constant 0 : i32
    %c0_i32_0 = arith.constant 0 : i32
    %c0_i32_1 = arith.constant 0 : i32
    return %arg0, %c0_i32, %c0_i32_0 : i32, i32, i32
  }
  func.func @transform_1(%arg0: i32) -> (i32, i32) {
    %c0_i32 = arith.constant 0 : i32
    %c0_i32_0 = arith.constant 0 : i32
    %c0_i32_1 = arith.constant 0 : i32
    return %c0_i32, %c0_i32_0 : i32, i32
  }
  func.func @transform_2(%arg0: i32) -> (i32, i32) {
    %c0_i32 = arith.constant 0 : i32
    %c0_i32_0 = arith.constant 0 : i32
    %c0_i32_1 = arith.constant 0 : i32
    return %c0_i32, %c0_i32_0 : i32, i32
  }
  func.func @transform_3(%arg0: i32) -> (i32, i32) {
    %c0_i32 = arith.constant 0 : i32
    %c0_i32_0 = arith.constant 0 : i32
    %c0_i32_1 = arith.constant 0 : i32
    return %c0_i32, %c0_i32_0 : i32, i32
  }
  func.func @transform_4(%arg0: i32) -> (i32, i32) {
    %c0_i32 = arith.constant 0 : i32
    %c0_i32_0 = arith.constant 0 : i32
    %c0_i32_1 = arith.constant 0 : i32
    return %c0_i32, %c0_i32_0 : i32, i32
  }
  func.func @transform_5(%arg0: i32) -> (i32, i32) {
    %c0_i32 = arith.constant 0 : i32
    %c0_i32_0 = arith.constant 0 : i32
    return %arg0, %c0_i32 : i32, i32
  }
}

</mosaic_0001>

<bundles_post_ra>
// kernel: tpu_custom_call.1
= control target key start
LH: loop header
LB: loop body
LE: loop exit
PB: predicated region body
PF: predicated region fallthrough
CT: control target
= control target key end

     0   :  { %10 = vsyncpa [#allocation3], 0  ;;  %s431_s0 = inlined_call_operand.hbm [shape: f32[8,16,128], index: 0, kind: input, shape index: {}]   ;;  %s432_s1 = inlined_call_operand.hbm [shape: f32[128,128], index: 1, kind: input, shape index: {}]   ;;  %s433_s2 = inlined_call_operand.vmem [shape: f32[1,128], index: 2, kind: input, shape index: {}]   ;;  %s434_s3 = inlined_call_operand.hbm [shape: f32[128,128], index: 3, kind: input, shape index: {}]   ;;  %s435_s4 = inlined_call_operand.vmem [shape: f32[1,128], index: 4, kind: input, shape index: {}]   ;;  %s436_s5 = inlined_call_operand.hbm [shape: f32[8,128], index: 5, kind: output, shape index: {}]  }
   0x1   :  { %11 = vsyncpa [#allocation6], 0 }
   0x2   :  { %12 = vsyncpa [#allocation4], 0  ;;  %s30_s20 = sshll.u32 %s432_s1, 4  ;;  %s373_s21 = smov [#allocation5]   ;;  %s31_s20 = int_to_ptr.hbm [resolvable:$true] %s30_s20 }
   0x3   :  { %s32_s22 = sshll.u32 %s373_s21, 4  ;;  %s17_s25 = sshll.u32 %s431_s0, 4  ;;  %s33_s22 = int_to_ptr.vmem [resolvable:$true] %s32_s22  ;;  %s18_s25 = int_to_ptr.hbm [resolvable:$true] %s17_s25 }
   0x4   :  { %s374_s26 = smov 128   ;;  %s375_s27 = smov 8  }
   0x5   :  { %38 = dma.hbm_to_vmem [thread:$0]  %s31_s20, 2048, %s33_s22, [#allocation6], %s374_s26, %s374_s26, %s375_s27  }
   0x6   :  { %s376_s28 = smov [#allocation2]   ;;  %s45_s7 = sshll.u32 %s434_s3, 4  ;;  %s46_s7 = int_to_ptr.hbm [resolvable:$true] %s45_s7 }
   0x7   :  { %s19_s29 = sshll.u32 %s376_s28, 4  ;;  %s377_s1 = smov [#allocation7]   ;;  %s20_s29 = int_to_ptr.vmem [resolvable:$true] %s19_s29 }
   0x8   :  { %25 = dma.hbm_to_vmem [thread:$0]  %s18_s25, 2048, %s20_s29, [#allocation3], %s374_s26, %s374_s26, %s375_s27  }
   0x9   :  { %s47_s8 = sshll.u32 %s377_s1, 4  ;;  %s48_s8 = int_to_ptr.vmem [resolvable:$true] %s47_s8 }
   0xa   :  { %53 = dma.hbm_to_vmem [thread:$0]  %s46_s7, 2048, %s48_s8, [#allocation6], %s374_s26, %s374_s26, %s375_s27  }
   0xb   :  { %367 = dma.done.wait [#allocation3], 2048  }
   0xc   :  { %368 = vsyncadd [#allocation3], 4294965248 }
   0xd   :  { %369 = dma.done.wait [#allocation6], 4096  }
   0xe   :  { %370 = vsyncadd [#allocation6], 4294963200  ;;  %v99_v0 = vld [vmem:[#allocation5 + $0x78] sm:$0xff]  ;;  %v98_v1 = vld [vmem:[#allocation5 + $0x70] sm:$0xff]  ;;  %vm185_vm0 = vcmask 1041409   ;;  %vm187_vm1 = vcmask 1042434  }
   0xf   :  { %200 = vmatpush.msra.mxu0 %v99_v0  ;;  %v97_v2 = vld [vmem:[#allocation5 + $0x68] sm:$0xff]  ;;  %v96_v3 = vld [vmem:[#allocation5 + $0x60] sm:$0xff]  ;;  %v95_v4 = vld [vmem:[#allocation5 + $0x58] sm:$0xff]  ;;  %vm189_vm2 = vcmask 1043459   ;;  %vm191_vm3 = vcmask 1044484   ;;  %vm193_vm4 = vcmask 1045509  }
  0x10   :  { %v68_v5 = vld [vmem:[#allocation2] sm:$0xff]  ;;  %v69_v6 = vld [vmem:[#allocation2 + $0x8] sm:$0xff]  ;;  %v94_v7 = vld [vmem:[#allocation5 + $0x50] sm:$0xff]  ;;  %vm195_vm5 = vcmask 1046534   ;;  %vm197_vm6 = vcmask 1047559   ;;  %s378_s11 = smov [#allocation8]  }
  0x11   :  { %201 = vmatpush.msra.mxu0 %v98_v1  ;;  %v70_v8 = vld [vmem:[#allocation2 + $0x10] sm:$0xff]  ;;  %v71_v9 = vld [vmem:[#allocation2 + $0x18] sm:$0xff]  ;;  %v72_v10 = vld [vmem:[#allocation2 + $0x20] sm:$0xff]  ;;  %v118_v11 = vadd.f32 %v69_v6, %v68_v5  ;;  %s250_s12 = sshll.u32 %s378_s11, 4  ;;  %s252_s15 = sshll.u32 %s436_s5, 4  ;;  %s251_s12 = int_to_ptr.vmem [resolvable:$true] %s250_s12  ;;  %s253_s15 = int_to_ptr.hbm [resolvable:$true] %s252_s15 }
  0x12   :  { %v73_v12 = vld [vmem:[#allocation2 + $0x28] sm:$0xff]  ;;  %v74_v13 = vld [vmem:[#allocation2 + $0x30] sm:$0xff]  ;;  %v75_v14 = vld [vmem:[#allocation2 + $0x38] sm:$0xff]  ;;  %v125_v15 = vadd.f32 %v71_v9, %v70_v8 }
  0x13   :  { %202 = vmatpush.msra.mxu0 %v97_v2  ;;  %v93_v16 = vld [vmem:[#allocation5 + $0x48] sm:$0xff]  ;;  %v76_v17 = vld [vmem:[#allocation2 + $0x40] sm:$0xff]  ;;  %v78_v19 = vld [vmem:[#allocation2 + $0x50] sm:$0xff]  ;;  %v119_v20 = vrot.slane %v118_v11, 4  ;;  %v132_v21 = vadd.f32 %v73_v12, %v72_v10  ;;  %v139_v22 = vadd.f32 %v75_v14, %v74_v13 }
  0x14   :  { %v77_v18 = vld [vmem:[#allocation2 + $0x48] sm:$0xff]  ;;  %v79_v23 = vld [vmem:[#allocation2 + $0x58] sm:$0xff]  ;;  %v80_v24 = vld [vmem:[#allocation2 + $0x60] sm:$0xff]  ;;  %v126_v26 = vrot.slane %v125_v15, 4 }
  0x15   :  { %203 = vmatpush.msra.mxu0 %v96_v3  ;;  %v81_v25 = vld [vmem:[#allocation2 + $0x68] sm:$0xff]  ;;  %v146_v27 = vadd.f32 %v77_v18, %v76_v17  ;;  %v82_v28 = vld [vmem:[#allocation2 + $0x70] sm:$0xff]  ;;  %v83_v29 = vld [vmem:[#allocation2 + $0x78] sm:$0xff]  ;;  %v120_v30 = vadd.f32 %v119_v20, %v118_v11  ;;  %v133_v31 = vrot.slane %v132_v21, 4  ;;  %v140_v32 = vrot.slane %v139_v22, 4 }
  0x16   :  { %v153_v33 = vadd.f32 %v79_v23, %v78_v19  ;;  %v116_v34 = vld [vmem:[#allocation7 + $0x78] sm:$0xff]  ;;  %v127_v35 = vadd.f32 %v126_v26, %v125_v15  ;;  %v160_v37 = vadd.f32 %v81_v25, %v80_v24  ;;  %v167_v38 = vadd.f32 %v83_v29, %v82_v28  ;;  %v115_v39 = vld [vmem:[#allocation7 + $0x70] sm:$0xff]  ;;  %v92_v40 = vld [vmem:[#allocation5 + $0x40] sm:$0xff] }
  0x17   :  { %204 = vmatpush.msra.mxu0 %v95_v4  ;;  %v147_v36 = vrot.slane %v146_v27, 4  ;;  %224 = vmatpush.msra.mxu1 %v116_v34  ;;  %v121_v41 = vrot.slane %v120_v30, 2  ;;  %v134_v42 = vadd.f32 %v133_v31, %v132_v21  ;;  %v141_v43 = vadd.f32 %v140_v32, %v139_v22  ;;  %v114_v45 = vld [vmem:[#allocation7 + $0x68] sm:$0xff]  ;;  %v91_v50 = vld [vmem:[#allocation5 + $0x38] sm:$0xff]  ;;  %v113_v55 = vld [vmem:[#allocation7 + $0x60] sm:$0xff] }
  0x18   :  { %v154_v44 = vrot.slane %v153_v33, 4  ;;  %v128_v46 = vrot.slane %v127_v35, 2  ;;  %v161_v48 = vrot.slane %v160_v37, 4  ;;  %v168_v49 = vrot.slane %v167_v38, 4  ;;  %v90_v60 = vld [vmem:[#allocation5 + $0x30] sm:$0xff]  ;;  %v112_v1 = vld [vmem:[#allocation7 + $0x58] sm:$0xff] }
  0x19   :  { %205 = vmatpush.msra.mxu0 %v94_v7  ;;  %v148_v47 = vadd.f32 %v147_v36, %v146_v27  ;;  %225 = vmatpush.msra.mxu1 %v115_v39  ;;  %v122_v51 = vadd.f32 %v121_v41, %v120_v30  ;;  %v135_v52 = vrot.slane %v134_v42, 2  ;;  %v142_v53 = vrot.slane %v141_v43, 2  ;;  %v89_v6 = vld [vmem:[#allocation5 + $0x28] sm:$0xff]  ;;  %v111_v11 = vld [vmem:[#allocation7 + $0x50] sm:$0xff]  ;;  %v87_v25 = vld [vmem:[#allocation5 + $0x18] sm:$0xff] }
  0x1a   :  { %v155_v54 = vadd.f32 %v154_v44, %v153_v33  ;;  %v129_v56 = vadd.f32 %v128_v46, %v127_v35  ;;  %v162_v58 = vadd.f32 %v161_v48, %v160_v37  ;;  %v169_v59 = vadd.f32 %v168_v49, %v167_v38  ;;  %v110_v20 = vld [vmem:[#allocation7 + $0x48] sm:$0xff]  ;;  %v109_v28 = vld [vmem:[#allocation7 + $0x40] sm:$0xff]  ;;  %v86_v31 = vld [vmem:[#allocation5 + $0x10] sm:$0xff] }
  0x1b   :  { %206 = vmatpush.msra.mxu0 %v93_v16  ;;  %v149_v57 = vrot.slane %v148_v47, 2  ;;  %226 = vmatpush.msra.mxu1 %v114_v45  ;;  %v123_v61 = vrot.slane %v122_v51, 1  ;;  %v136_v62 = vadd.f32 %v135_v52, %v134_v42  ;;  %v143_v63 = vadd.f32 %v142_v53, %v141_v43  ;;  %v88_v16 = vld [vmem:[#allocation5 + $0x20] sm:$0xff]  ;;  %v108_v33 = vld [vmem:[#allocation7 + $0x38] sm:$0xff]  ;;  %v85_v36 = vld [vmem:[#allocation5 + $0x8] sm:$0xff] }
  0x1c   :  { %v156_v0 = vrot.slane %v155_v54, 2  ;;  %v130_v2 = vrot.slane %v129_v56, 1  ;;  %v163_v4 = vrot.slane %v162_v58, 2  ;;  %v170_v5 = vrot.slane %v169_v59, 2  ;;  %v107_v38 = vld [vmem:[#allocation7 + $0x30] sm:$0xff]  ;;  %v84_v39 = vld [vmem:[#allocation5] sm:$0xff] }
  0x1d   :  { %207 = vmatpush.msra.mxu0 %v92_v40  ;;  %v150_v3 = vadd.f32 %v149_v57, %v148_v47  ;;  %227 = vmatpush.msra.mxu1 %v113_v55  ;;  %v124_v7 = vadd.f32 %v123_v61, %v122_v51  ;;  %v137_v8 = vrot.slane %v136_v62, 1  ;;  %v144_v9 = vrot.slane %v143_v63, 1  ;;  %v106_v40 = vld [vmem:[#allocation7 + $0x28] sm:$0xff]  ;;  %v105_v42 = vld [vmem:[#allocation7 + $0x20] sm:$0xff]  ;;  %v104_v43 = vld [vmem:[#allocation7 + $0x18] sm:$0xff] }
  0x1e   :  { %v157_v10 = vadd.f32 %v156_v0, %v155_v54  ;;  %v131_v12 = vadd.f32 %v130_v2, %v129_v56  ;;  %v164_v14 = vadd.f32 %v163_v4, %v162_v58  ;;  %v171_v15 = vadd.f32 %v170_v5, %v169_v59  ;;  %v103_v44 = vld [vmem:[#allocation7 + $0x10] sm:$0xff]  ;;  %v102_v45 = vld [vmem:[#allocation7 + $0x8] sm:$0xff]  ;;  %v101_v46 = vld [vmem:[#allocation7] sm:$0xff] }
  0x1f   :  { %208 = vmatpush.msra.mxu0 %v91_v50  ;;  %v151_v13 = vrot.slane %v150_v3, 1  ;;  %228 = vmatpush.msra.mxu1 %v112_v1  ;;  %v138_v17 = vadd.f32 %v137_v8, %v136_v62  ;;  %v145_v18 = vadd.f32 %v144_v9, %v143_v63  ;;  %v269_v47 = vld [vmem:[%s433_s2] ss:$0 sm:$0xff] }
  0x20   :  { %v158_v19 = vrot.slane %v157_v10, 1  ;;  %v165_v22 = vrot.slane %v164_v14, 1  ;;  %v172_v23 = vrot.slane %v171_v15, 1  ;;  %v186_v24 = vsel %vm185_vm0, %v131_v12, %v124_v7  ;;  %v270_v51 = vld [vmem:[%s435_s4] ss:$0 sm:$0xff] }
  0x21   :  { %209 = vmatpush.msra.mxu0 %v90_v60  ;;  %v152_v21 = vadd.f32 %v151_v13, %v150_v3  ;;  %229 = vmatpush.msra.mxu1 %v111_v11  ;;  %v188_v27 = vsel %vm187_vm1, %v138_v17, %v186_v24 }
  0x22   :  { %v159_v26 = vadd.f32 %v158_v19, %v157_v10  ;;  %v166_v29 = vadd.f32 %v165_v22, %v164_v14  ;;  %v190_v30 = vsel %vm189_vm2, %v145_v18, %v188_v27  ;;  %v173_v34 = vadd.f32 %v172_v23, %v171_v15 }
  0x23   :  { %210 = vmatpush.msra.mxu0 %v89_v6  ;;  %230 = vmatpush.msra.mxu1 %v110_v20  ;;  %v192_v32 = vsel %vm191_vm3, %v152_v21, %v190_v30 }
  0x24   :  { %v194_v35 = vsel %vm193_vm4, %v159_v26, %v192_v32 }
  0x25   :  { %211 = vmatpush.msra.mxu0 %v88_v16  ;;  %231 = vmatpush.msra.mxu1 %v109_v28  ;;  %v196_v37 = vsel %vm195_vm5, %v166_v29, %v194_v35 }
  0x26   :  { %v198_v41 = vsel %vm197_vm6, %v173_v34, %v196_v37 }
  0x27   :  { %212 = vmatpush.msra.mxu0 %v87_v25  ;;  %232 = vmatpush.msra.mxu1 %v108_v33 }
  0x29   :  { %213 = vmatpush.msra.mxu0 %v86_v31  ;;  %233 = vmatpush.msra.mxu1 %v107_v38 }
  0x2b   :  { %214 = vmatpush.msra.mxu0 %v85_v36  ;;  %234 = vmatpush.msra.mxu1 %v106_v40 }
  0x2d   :  { %215 = vmatpush.msra.mxu0 %v84_v39  ;;  %235 = vmatpush.msra.mxu1 %v105_v42 }
  0x2e   :  { %216 = vmatmul.f32.vlgmr.msra.gmra.mxu0 %v198_v41 }
  0x2f   :  { %236 = vmatpush.msra.mxu1 %v104_v43 }
  0x31   :  { %237 = vmatpush.msra.mxu1 %v103_v44 }
  0x33   :  { %238 = vmatpush.msra.mxu1 %v102_v45 }
  0x35   :  { %239 = vmatpush.msra.mxu1 %v101_v46 }
  0xab   :  { %v217_v48 = vpop.f32.mrf.mxu0 }
  0xac   :  { %v218_v49 = vadd.f32 %v269_v47, %v217_v48 }
  0xae   :  { %v220_v50 = vmax.f32 %v218_v49, 0.0 }
  0xb0   :  { %240 = vmatmul.f32.vlgmr.msra.gmra.mxu1 %v220_v50 }
 0x12d   :  { %v241_v52 = vpop.f32.mrf.mxu1 }
 0x12e   :  { %v242_v53 = vadd.f32 %v270_v51, %v241_v52 }
 0x130   :  { %244 = vst [vmem:[#allocation8] sm:$0xff] %v242_v53 }
 0x131   :  { %255 = dma.vmem_to_hbm [thread:$0]  %s251_s12, 128, %s253_s15, [#allocation4]  }
 0x132   :  { %371 = dma.done.wait [#allocation4], 128  }
 0x133   :  { %372 = vsyncadd [#allocation4], 4294967168 }
 0x134   :  { %260 = vsyncpa [#allocation3], 1 }
 0x135   :  { %261 = vsyncpa [#allocation6], 1 }
 0x136   :  { %262 = vsyncpa [#allocation4], 1 }

</bundles_post_ra>
